<compile_context>
chip_gen: v7x
topology: tpu7x:2x2x1
jax: 0.10.0
libtpu: 0.0.40
codegen_flags: <defaults>
</compile_context>

<pallas_src>
import jax
import jax.numpy as jnp
from jax.experimental import pallas as pl
from jax.experimental.pallas import tpu as pltpu


def _make_kernel(block_n, c_in, c_out, T, V, Kt, compute_dtype):
    pad = (Kt - 1) // 2
    TV = T * V
    padV = pad * V

    def kernel(x_ref, abd_ref, wg_ref, bg_ref, t1_ref, a1_ref,
               wt_ref, t2_ref, a2_ref, out_ref, zp_ref):
        # x_ref:   (block_n, C_in, T*V)  f32, lane-dense (lanes = T*V)
        # abd_ref: (T*V, T*V)            block-diagonal adjacency, compute_dtype
        # wg_ref:  (C_out, C_in)         1x1-conv weight with BN1 scale folded in
        # wt_ref:  (C_out, Kt*C_out)     temporal-conv weight (im2col layout, BN2 folded)
        # zp_ref:  (block_n, C_out, (T + 2*pad)*V) VMEM scratch (padded activation)
        abd = abd_ref[...]
        wg = wg_ref[...]
        wt = wt_ref[...]
        bg = bg_ref[...]          # (C_out, 1) broadcasts over lanes
        t1 = t1_ref[...]
        a1 = a1_ref[...]
        t2 = t2_ref[...]
        a2 = a2_ref[...]

        # Zero only the temporal-padding halo of the scratch (middle is overwritten below).
        if pad > 0:
            halo = jnp.zeros((block_n, c_out, padV), jnp.float32)
            zp_ref[:, :, :padV] = halo
            zp_ref[:, :, padV + TV:] = halo

        for b in range(block_n):                      # static unroll over samples in block
            xb = x_ref[b]                             # (C_in, T*V) f32
            # 1) 1x1 conv (BN1 scale pre-folded into wg / bg), bias added BEFORE the mix.
            h = jnp.dot(wg, xb.astype(compute_dtype),
                        preferred_element_type=jnp.float32) + bg
            # 2) Graph mixing: one (C, T*V) x (T*V, T*V) matmul against block-diag A.
            z = jnp.dot(h.astype(compute_dtype), abd,
                        preferred_element_type=jnp.float32)
            # 3) BN1 shift + PReLU (f32 pointwise).
            z = z + t1
            z = jnp.where(z >= 0.0, z, z * a1)
            # 4) Temporal (Kt,1) conv: write into padded scratch, im2col the Kt taps,
            #    single matmul with contraction depth Kt*C.
            zp_ref[b, :, padV:padV + TV] = z
            if Kt > 1:
                zim = jnp.concatenate(
                    [zp_ref[b, :, k * V:k * V + TV] for k in range(Kt)], axis=0)
            else:
                zim = z
            y = jnp.dot(wt, zim.astype(compute_dtype),
                        preferred_element_type=jnp.float32)
            # 5) BN2 shift (temporal-conv bias folded in) + identity residual + PReLU.
            y = y + t2 + xb
            y = jnp.where(y >= 0.0, y, y * a2)
            out_ref[b] = y.astype(out_ref.dtype)

    return kernel


def fold_params(p, compute_dtype, eps=1e-5):
    """Constant-fold eval-mode BatchNorms / temporal bias into kernel-ready arrays."""
    s1 = p["bn1_gamma"] / jnp.sqrt(p["bn1_var"] + eps)
    sh1 = p["bn1_beta"] - p["bn1_mean"] * s1
    s2 = p["bn2_gamma"] / jnp.sqrt(p["bn2_var"] + eps)
    sh2 = p["bn2_beta"] - p["bn2_mean"] * s2

    c_out, c_in = p["w_g"].shape
    kt = p["w_t"].shape[2]

    wg = s1[:, None] * p["w_g"]                         # BN1 scale commutes through the mix
    bg = (s1 * p["b_g"])[:, None]
    t1 = sh1[:, None]
    # Temporal conv weight (C_out, C_in, Kt) -> BN2-scaled, im2col layout (C_out, Kt*C_in)
    # matching zim rows ordered [k*C + c].
    wt = (s2[:, None, None] * p["w_t"]).transpose(0, 2, 1).reshape(c_out, kt * c_in)
    t2 = (sh2 + s2 * p["b_t"])[:, None]                 # BN2 shift absorbs the conv bias
    a1 = jnp.broadcast_to(p["alpha1"], (c_out,))[:, None]
    a2 = jnp.broadcast_to(p["alpha2"], (c_out,))[:, None]
    f32 = jnp.float32
    return dict(wg=wg.astype(compute_dtype), bg=bg.astype(f32), t1=t1.astype(f32),
                a1=a1.astype(f32), wt=wt.astype(compute_dtype), t2=t2.astype(f32),
                a2=a2.astype(f32))


def st_gcn_forward(x_nctv, A, params, *, block_n=2, compute_dtype=jnp.float32):
    """Eval-mode st_gcn forward. x_nctv: (N, C_in, T, V); A: (K=T, V, V).

    Returns (out (N, C_out, T, V), A). Use compute_dtype=jnp.bfloat16 on v6e/v7x for the
    matmul operands; pointwise math stays f32 either way.
    """
    N, C_in, T, V = x_nctv.shape
    assert A.shape[0] == T, "module's einsum 'nctv,tvw->nctw' indexes A by time (K == T)"
    kp = fold_params(params, compute_dtype)
    C_out, Kt = kp["wg"].shape[0], params["w_t"].shape[2]
    pad = (Kt - 1) // 2
    assert C_in == C_out, "identity residual path requires in_channels == out_channels"
    # TODO(synk): the 1x1-conv + BN residual branch (in != out or stride > 1), stride > 1
    #             temporal downsampling, and residual=False are not implemented.
    assert N % block_n == 0
    TV = T * V

    # Channel-first lane-dense slabs: merging (T, V) is a free reshape, no HBM transpose.
    x_flat = x_nctv.reshape(N, C_in, TV).astype(jnp.float32)

    # Block-diagonal adjacency: A_bd[(t,v),(t,w)] = A[t,v,w]; graph mixing = one matmul.
    a_bd = jnp.einsum('tvw,ts->tvsw', A.astype(jnp.float32),
                      jnp.eye(T, dtype=jnp.float32)).reshape(TV, TV).astype(compute_dtype)

    kernel = _make_kernel(block_n, C_in, C_out, T, V, Kt, compute_dtype)

    def whole(shape):
        zeros = (0,) * len(shape)
        return pl.BlockSpec(shape, lambda n: zeros)

    cost = pl.CostEstimate(
        flops=2 * N * TV * (C_in * C_out + V * C_out + Kt * C_out * C_out),
        transcendentals=0,
        bytes_accessed=4 * (2 * N * C_in * TV + TV * TV + C_out * C_in
                            + C_out * Kt * C_out + 6 * C_out),
    )

    out = pl.pallas_call(
        kernel,
        out_shape=jax.ShapeDtypeStruct((N, C_out, TV), jnp.float32),
        grid=(N // block_n,),
        in_specs=[
            pl.BlockSpec((block_n, C_in, TV), lambda n: (n, 0, 0)),   # x (block of samples)
            whole((TV, TV)),                                          # block-diag adjacency
            whole((C_out, C_in)), whole((C_out, 1)),                  # folded 1x1 conv
            whole((C_out, 1)), whole((C_out, 1)),                     # BN1 shift, PReLU1
            whole((C_out, Kt * C_out)),                               # folded temporal conv
            whole((C_out, 1)), whole((C_out, 1)),                     # BN2 shift(+bias), PReLU2
        ],
        out_specs=pl.BlockSpec((block_n, C_out, TV), lambda n: (n, 0, 0)),
        scratch_shapes=[pltpu.VMEM((block_n, C_out, (T + 2 * pad) * V), jnp.float32)],
        compiler_params=pltpu.CompilerParams(dimension_semantics=("parallel",)),
        cost_estimate=cost,
    )(x_flat, a_bd,
      kp["wg"], kp["bg"], kp["t1"], kp["a1"],
      kp["wt"], kp["t2"], kp["a2"])

    return out.reshape(N, C_out, T, V), A


def init_params(key, c_in, c_out, kt):
    """Deterministic synthetic module parameters (PyTorch-style, eval-mode BN stats)."""
    ks = jax.random.split(key, 12)
    u = lambda k, shape, s: jax.random.uniform(k, shape, jnp.float32, -s, s)
    s_g = 1.0 / float(c_in) ** 0.5
    s_t = 1.0 / float(c_out * kt) ** 0.5
    return dict(
        w_g=u(ks[0], (c_out, c_in), s_g),            # Conv2d(in, out, (1,1)) weight
        b_g=u(ks[1], (c_out,), s_g),
        bn1_gamma=1.0 + 0.1 * jax.random.normal(ks[2], (c_out,), jnp.float32),
        bn1_beta=0.1 * jax.random.normal(ks[3], (c_out,), jnp.float32),
        bn1_mean=0.1 * jax.random.normal(ks[4], (c_out,), jnp.float32),
        bn1_var=jax.nn.softplus(jax.random.normal(ks[5], (c_out,), jnp.float32)) + 0.5,
        alpha1=jnp.asarray(0.25, jnp.float32),       # nn.PReLU() default shared slope
        w_t=u(ks[6], (c_out, c_out, kt), s_t),       # Conv2d(out, out, (Kt,1)) weight
        b_t=u(ks[7], (c_out,), s_t),
        bn2_gamma=1.0 + 0.1 * jax.random.normal(ks[8], (c_out,), jnp.float32),
        bn2_beta=0.1 * jax.random.normal(ks[9], (c_out,), jnp.float32),
        bn2_mean=0.1 * jax.random.normal(ks[10], (c_out,), jnp.float32),
        bn2_var=jax.nn.softplus(jax.random.normal(ks[11], (c_out,), jnp.float32)) + 0.5,
        alpha2=jnp.asarray(0.25, jnp.float32),
    )


def reference_forward(x, A, p, eps=1e-5):
    """Pure-JAX reference matching the PyTorch st_gcn forward (eval mode)."""
    N, C, T, V = x.shape
    vec = lambda a: a[None, :, None, None]
    bn = lambda y, g, b, m, v: (y - vec(m)) / jnp.sqrt(vec(v) + eps) * vec(g) + vec(b)
    y = jnp.einsum('oc,nctv->notv', p["w_g"], x) + vec(p["b_g"])
    y = jnp.einsum('nctv,tvw->nctw', y, A)
    y = bn(y, p["bn1_gamma"], p["bn1_beta"], p["bn1_mean"], p["bn1_var"])
    y = jnp.where(y >= 0.0, y, p["alpha1"] * y)
    kt = p["w_t"].shape[2]
    pad = (kt - 1) // 2
    yp = jnp.pad(y, ((0, 0), (0, 0), (pad, pad), (0, 0)))
    z = sum(jnp.einsum('oc,nctv->notv', p["w_t"][:, :, k], yp[:, :, k:k + T, :])
            for k in range(kt))
    z = z + vec(p["b_t"])
    z = bn(z, p["bn2_gamma"], p["bn2_beta"], p["bn2_mean"], p["bn2_var"])
    z = z + x                                   # identity residual
    z = jnp.where(z >= 0.0, z, p["alpha2"] * z)
    return z, A


if __name__ == "__main__":
    # Small shapes consistent with the module: N=4 batch, C=32 channels (in == out),
    # T=8 time steps, V=16 graph nodes, kernel_size = (Kt, K) = (3, 8) with K == T.
    N, C, T, V, Kt = 4, 32, 8, 16, 3

    key = jax.random.PRNGKey(0)
    kx, ka, kp = jax.random.split(key, 3)
    x = jax.random.normal(kx, (N, C, T, V), jnp.float32)
    A = jax.random.normal(ka, (T, V, V), jnp.float32)   # (K, V, V) with K == T
    params = init_params(kp, C, C, Kt)

    out, a_out = st_gcn_forward(x, A, params, block_n=2)
    out = jax.block_until_ready(out)
    assert out.shape == (N, C, T, V)

    ref, _ = reference_forward(x, A, params)
    assert jnp.allclose(out, ref, atol=1e-3, rtol=1e-3), "Pallas st_gcn mismatch vs JAX reference"

    print("KERNEL_OK")
</pallas_src>

<mosaic_0001>
module attributes {stable_mosaic.version = 11 : i64} {
  func.func @kernel(%arg0: i32, %arg1: memref<2x32x128xf32, #tpu.memory_space<vmem>>, %arg2: memref<128x128xf32, #tpu.memory_space<vmem>>, %arg3: memref<32x32xf32, #tpu.memory_space<vmem>>, %arg4: memref<32x1xf32, #tpu.memory_space<vmem>>, %arg5: memref<32x1xf32, #tpu.memory_space<vmem>>, %arg6: memref<32x1xf32, #tpu.memory_space<vmem>>, %arg7: memref<32x96xf32, #tpu.memory_space<vmem>>, %arg8: memref<32x1xf32, #tpu.memory_space<vmem>>, %arg9: memref<32x1xf32, #tpu.memory_space<vmem>>, %arg10: memref<2x32x128xf32, #tpu.memory_space<vmem>>, %arg11: memref<2x32x160xf32, #tpu.memory_space<vmem>>) attributes {dimension_semantics = [#tpu.dimension_semantics<parallel>], iteration_bounds = array<i64: 2>, scalar_prefetch = 0 : i64, scratch_operands = 1 : i64, tpu.core_type = #tpu.core_type<tc>, window_params = [{transform_indices = @transform_0, window_bounds = array<i64: 2, 32, 128>}, {pipeline_mode = #tpu.pipeline_mode<synchronous>, transform_indices = @transform_1, window_bounds = array<i64: 128, 128>}, {pipeline_mode = #tpu.pipeline_mode<synchronous>, transform_indices = @transform_2, window_bounds = array<i64: 32, 32>}, {pipeline_mode = #tpu.pipeline_mode<synchronous>, transform_indices = @transform_3, window_bounds = array<i64: 32, 1>}, {pipeline_mode = #tpu.pipeline_mode<synchronous>, transform_indices = @transform_4, window_bounds = array<i64: 32, 1>}, {pipeline_mode = #tpu.pipeline_mode<synchronous>, transform_indices = @transform_5, window_bounds = array<i64: 32, 1>}, {pipeline_mode = #tpu.pipeline_mode<synchronous>, transform_indices = @transform_6, window_bounds = array<i64: 32, 96>}, {pipeline_mode = #tpu.pipeline_mode<synchronous>, transform_indices = @transform_7, window_bounds = array<i64: 32, 1>}, {pipeline_mode = #tpu.pipeline_mode<synchronous>, transform_indices = @transform_8, window_bounds = array<i64: 32, 1>}, {transform_indices = @transform_9, window_bounds = array<i64: 2, 32, 128>}]} {
    %c0 = arith.constant 0 : index
    %c0_0 = arith.constant 0 : index
    %0 = vector.load %arg2[%c0, %c0_0] : memref<128x128xf32, #tpu.memory_space<vmem>>, vector<128x128xf32>
    %c0_1 = arith.constant 0 : index
    %c0_2 = arith.constant 0 : index
    %1 = vector.load %arg3[%c0_1, %c0_2] : memref<32x32xf32, #tpu.memory_space<vmem>>, vector<32x32xf32>
    %c0_3 = arith.constant 0 : index
    %c0_4 = arith.constant 0 : index
    %2 = vector.load %arg7[%c0_3, %c0_4] : memref<32x96xf32, #tpu.memory_space<vmem>>, vector<32x96xf32>
    %c0_5 = arith.constant 0 : index
    %c0_6 = arith.constant 0 : index
    %3 = vector.load %arg4[%c0_5, %c0_6] : memref<32x1xf32, #tpu.memory_space<vmem>>, vector<32x1xf32>
    %c0_7 = arith.constant 0 : index
    %c0_8 = arith.constant 0 : index
    %4 = vector.load %arg5[%c0_7, %c0_8] : memref<32x1xf32, #tpu.memory_space<vmem>>, vector<32x1xf32>
    %c0_9 = arith.constant 0 : index
    %c0_10 = arith.constant 0 : index
    %5 = vector.load %arg6[%c0_9, %c0_10] : memref<32x1xf32, #tpu.memory_space<vmem>>, vector<32x1xf32>
    %c0_11 = arith.constant 0 : index
    %c0_12 = arith.constant 0 : index
    %6 = vector.load %arg8[%c0_11, %c0_12] : memref<32x1xf32, #tpu.memory_space<vmem>>, vector<32x1xf32>
    %c0_13 = arith.constant 0 : index
    %c0_14 = arith.constant 0 : index
    %7 = vector.load %arg9[%c0_13, %c0_14] : memref<32x1xf32, #tpu.memory_space<vmem>>, vector<32x1xf32>
    %cst = arith.constant 0.000000e+00 : f32
    %8 = vector.broadcast %cst : f32 to vector<2x32x16xf32>
    %c0_15 = arith.constant 0 : index
    %c0_16 = arith.constant 0 : index
    %c0_17 = arith.constant 0 : index
    %9 = vector.load %arg11[%c0_15, %c0_16, %c0_17] : memref<2x32x160xf32, #tpu.memory_space<vmem>>, vector<2x32x16xf32>
    tpu.vector_store %arg11[%c0_15, %c0_16, %c0_17], %8 {strides = array<i32>} : memref<2x32x160xf32, #tpu.memory_space<vmem>>, vector<2x32x16xf32>,
    %c0_18 = arith.constant 0 : index
    %c0_19 = arith.constant 0 : index
    %c144 = arith.constant 144 : index
    %10 = vector.load %arg11[%c0_18, %c0_19, %c144] : memref<2x32x160xf32, #tpu.memory_space<vmem>>, vector<2x32x16xf32>
    tpu.vector_store %arg11[%c0_18, %c0_19, %c144], %8 {strides = array<i32>} : memref<2x32x160xf32, #tpu.memory_space<vmem>>, vector<2x32x16xf32>,
    %c0_20 = arith.constant 0 : index
    %c0_21 = arith.constant 0 : index
    %c0_22 = arith.constant 0 : index
    %11 = vector.load %arg1[%c0_20, %c0_21, %c0_22] : memref<2x32x128xf32, #tpu.memory_space<vmem>>, vector<1x32x128xf32>
    %12 = vector.shape_cast %11 : vector<1x32x128xf32> to vector<32x128xf32>
    %cst_23 = arith.constant dense<0.000000e+00> : vector<32x128xf32>
    %13 = tpu.matmul %1, %12, %cst_23 {dimension_numbers = #tpu.dot_dimension_numbers<[1], [0], [0], [1], [0, 0, 1, 1], [], []>} : vector<32x32xf32>, vector<32x128xf32>, vector<32x128xf32> -> vector<32x128xf32>
    %14 = vector.broadcast %3 : vector<32x1xf32> to vector<32x128xf32>
    %15 = arith.addf %13, %14 : vector<32x128xf32>
    %cst_24 = arith.constant dense<0.000000e+00> : vector<32x128xf32>
    %16 = tpu.matmul %15, %0, %cst_24 {dimension_numbers = #tpu.dot_dimension_numbers<[1], [0], [0], [1], [0, 0, 1, 1], [], []>} : vector<32x128xf32>, vector<128x128xf32>, vector<32x128xf32> -> vector<32x128xf32>
    %17 = vector.broadcast %4 : vector<32x1xf32> to vector<32x128xf32>
    %18 = arith.addf %16, %17 : vector<32x128xf32>
    %cst_25 = arith.constant 0.000000e+00 : f32
    %19 = vector.broadcast %cst_25 : f32 to vector<32x128xf32>
    %20 = arith.cmpf oge, %18, %19 : vector<32x128xf32>
    %21 = vector.broadcast %5 : vector<32x1xf32> to vector<32x128xf32>
    %22 = arith.mulf %18, %21 : vector<32x128xf32>
    %23 = arith.select %20, %18, %22 : vector<32x128xi1>, vector<32x128xf32>
    %c0_26 = arith.constant 0 : index
    %c0_27 = arith.constant 0 : index
    %c16 = arith.constant 16 : index
    %24 = vector.load %arg11[%c0_26, %c0_27, %c16] : memref<2x32x160xf32, #tpu.memory_space<vmem>>, vector<1x32x128xf32>
    %25 = vector.shape_cast %24 : vector<1x32x128xf32> to vector<32x128xf32>
    %26 = vector.shape_cast %23 : vector<32x128xf32> to vector<1x32x128xf32>
    tpu.vector_store %arg11[%c0_26, %c0_27, %c16], %26 {strides = array<i32>} : memref<2x32x160xf32, #tpu.memory_space<vmem>>, vector<1x32x128xf32>,
    %c0_28 = arith.constant 0 : index
    %c0_29 = arith.constant 0 : index
    %c0_30 = arith.constant 0 : index
    %27 = vector.load %arg11[%c0_28, %c0_29, %c0_30] : memref<2x32x160xf32, #tpu.memory_space<vmem>>, vector<1x32x128xf32>
    %28 = vector.shape_cast %27 : vector<1x32x128xf32> to vector<32x128xf32>
    %c0_31 = arith.constant 0 : index
    %c0_32 = arith.constant 0 : index
    %c16_33 = arith.constant 16 : index
    %29 = vector.load %arg11[%c0_31, %c0_32, %c16_33] : memref<2x32x160xf32, #tpu.memory_space<vmem>>, vector<1x32x128xf32>
    %30 = vector.shape_cast %29 : vector<1x32x128xf32> to vector<32x128xf32>
    %c0_34 = arith.constant 0 : index
    %c0_35 = arith.constant 0 : index
    %c32 = arith.constant 32 : index
    %31 = vector.load %arg11[%c0_34, %c0_35, %c32] : memref<2x32x160xf32, #tpu.memory_space<vmem>>, vector<1x32x128xf32>
    %32 = vector.shape_cast %31 : vector<1x32x128xf32> to vector<32x128xf32>
    %33 = tpu.concatenate %28, %30, %32 in 0 : vector<32x128xf32>, vector<32x128xf32>, vector<32x128xf32> -> vector<96x128xf32>
    %cst_36 = arith.constant dense<0.000000e+00> : vector<32x128xf32>
    %34 = tpu.matmul %2, %33, %cst_36 {dimension_numbers = #tpu.dot_dimension_numbers<[1], [0], [0], [1], [0, 0, 1, 1], [], []>} : vector<32x96xf32>, vector<96x128xf32>, vector<32x128xf32> -> vector<32x128xf32>
    %35 = vector.broadcast %6 : vector<32x1xf32> to vector<32x128xf32>
    %36 = arith.addf %34, %35 : vector<32x128xf32>
    %37 = arith.addf %36, %12 : vector<32x128xf32>
    %cst_37 = arith.constant 0.000000e+00 : f32
    %38 = vector.broadcast %cst_37 : f32 to vector<32x128xf32>
    %39 = arith.cmpf oge, %37, %38 : vector<32x128xf32>
    %40 = vector.broadcast %7 : vector<32x1xf32> to vector<32x128xf32>
    %41 = arith.mulf %37, %40 : vector<32x128xf32>
    %42 = arith.select %39, %37, %41 : vector<32x128xi1>, vector<32x128xf32>
    %c0_38 = arith.constant 0 : index
    %c0_39 = arith.constant 0 : index
    %c0_40 = arith.constant 0 : index
    %43 = vector.load %arg10[%c0_38, %c0_39, %c0_40] : memref<2x32x128xf32, #tpu.memory_space<vmem>>, vector<1x32x128xf32>
    %44 = vector.shape_cast %43 : vector<1x32x128xf32> to vector<32x128xf32>
    %45 = vector.shape_cast %42 : vector<32x128xf32> to vector<1x32x128xf32>
    tpu.vector_store %arg10[%c0_38, %c0_39, %c0_40], %45 {strides = array<i32>} : memref<2x32x128xf32, #tpu.memory_space<vmem>>, vector<1x32x128xf32>,
    %c1 = arith.constant 1 : index
    %c0_41 = arith.constant 0 : index
    %c0_42 = arith.constant 0 : index
    %46 = vector.load %arg1[%c1, %c0_41, %c0_42] : memref<2x32x128xf32, #tpu.memory_space<vmem>>, vector<1x32x128xf32>
    %47 = vector.shape_cast %46 : vector<1x32x128xf32> to vector<32x128xf32>
    %cst_43 = arith.constant dense<0.000000e+00> : vector<32x128xf32>
    %48 = tpu.matmul %1, %47, %cst_43 {dimension_numbers = #tpu.dot_dimension_numbers<[1], [0], [0], [1], [0, 0, 1, 1], [], []>} : vector<32x32xf32>, vector<32x128xf32>, vector<32x128xf32> -> vector<32x128xf32>
    %49 = vector.broadcast %3 : vector<32x1xf32> to vector<32x128xf32>
    %50 = arith.addf %48, %49 : vector<32x128xf32>
    %cst_44 = arith.constant dense<0.000000e+00> : vector<32x128xf32>
    %51 = tpu.matmul %50, %0, %cst_44 {dimension_numbers = #tpu.dot_dimension_numbers<[1], [0], [0], [1], [0, 0, 1, 1], [], []>} : vector<32x128xf32>, vector<128x128xf32>, vector<32x128xf32> -> vector<32x128xf32>
    %52 = vector.broadcast %4 : vector<32x1xf32> to vector<32x128xf32>
    %53 = arith.addf %51, %52 : vector<32x128xf32>
    %cst_45 = arith.constant 0.000000e+00 : f32
    %54 = vector.broadcast %cst_45 : f32 to vector<32x128xf32>
    %55 = arith.cmpf oge, %53, %54 : vector<32x128xf32>
    %56 = vector.broadcast %5 : vector<32x1xf32> to vector<32x128xf32>
    %57 = arith.mulf %53, %56 : vector<32x128xf32>
    %58 = arith.select %55, %53, %57 : vector<32x128xi1>, vector<32x128xf32>
    %c1_46 = arith.constant 1 : index
    %c0_47 = arith.constant 0 : index
    %c16_48 = arith.constant 16 : index
    %59 = vector.load %arg11[%c1_46, %c0_47, %c16_48] : memref<2x32x160xf32, #tpu.memory_space<vmem>>, vector<1x32x128xf32>
    %60 = vector.shape_cast %59 : vector<1x32x128xf32> to vector<32x128xf32>
    %61 = vector.shape_cast %58 : vector<32x128xf32> to vector<1x32x128xf32>
    tpu.vector_store %arg11[%c1_46, %c0_47, %c16_48], %61 {strides = array<i32>} : memref<2x32x160xf32, #tpu.memory_space<vmem>>, vector<1x32x128xf32>,
    %c1_49 = arith.constant 1 : index
    %c0_50 = arith.constant 0 : index
    %c0_51 = arith.constant 0 : index
    %62 = vector.load %arg11[%c1_49, %c0_50, %c0_51] : memref<2x32x160xf32, #tpu.memory_space<vmem>>, vector<1x32x128xf32>
    %63 = vector.shape_cast %62 : vector<1x32x128xf32> to vector<32x128xf32>
    %c1_52 = arith.constant 1 : index
    %c0_53 = arith.constant 0 : index
    %c16_54 = arith.constant 16 : index
    %64 = vector.load %arg11[%c1_52, %c0_53, %c16_54] : memref<2x32x160xf32, #tpu.memory_space<vmem>>, vector<1x32x128xf32>
    %65 = vector.shape_cast %64 : vector<1x32x128xf32> to vector<32x128xf32>
    %c1_55 = arith.constant 1 : index
    %c0_56 = arith.constant 0 : index
    %c32_57 = arith.constant 32 : index
    %66 = vector.load %arg11[%c1_55, %c0_56, %c32_57] : memref<2x32x160xf32, #tpu.memory_space<vmem>>, vector<1x32x128xf32>
    %67 = vector.shape_cast %66 : vector<1x32x128xf32> to vector<32x128xf32>
    %68 = tpu.concatenate %63, %65, %67 in 0 : vector<32x128xf32>, vector<32x128xf32>, vector<32x128xf32> -> vector<96x128xf32>
    %cst_58 = arith.constant dense<0.000000e+00> : vector<32x128xf32>
    %69 = tpu.matmul %2, %68, %cst_58 {dimension_numbers = #tpu.dot_dimension_numbers<[1], [0], [0], [1], [0, 0, 1, 1], [], []>} : vector<32x96xf32>, vector<96x128xf32>, vector<32x128xf32> -> vector<32x128xf32>
    %70 = vector.broadcast %6 : vector<32x1xf32> to vector<32x128xf32>
    %71 = arith.addf %69, %70 : vector<32x128xf32>
    %72 = arith.addf %71, %47 : vector<32x128xf32>
    %cst_59 = arith.constant 0.000000e+00 : f32
    %73 = vector.broadcast %cst_59 : f32 to vector<32x128xf32>
    %74 = arith.cmpf oge, %72, %73 : vector<32x128xf32>
    %75 = vector.broadcast %7 : vector<32x1xf32> to vector<32x128xf32>
    %76 = arith.mulf %72, %75 : vector<32x128xf32>
    %77 = arith.select %74, %72, %76 : vector<32x128xi1>, vector<32x128xf32>
    %c1_60 = arith.constant 1 : index
    %c0_61 = arith.constant 0 : index
    %c0_62 = arith.constant 0 : index
    %78 = vector.load %arg10[%c1_60, %c0_61, %c0_62] : memref<2x32x128xf32, #tpu.memory_space<vmem>>, vector<1x32x128xf32>
    %79 = vector.shape_cast %78 : vector<1x32x128xf32> to vector<32x128xf32>
    %80 = vector.shape_cast %77 : vector<32x128xf32> to vector<1x32x128xf32>
    tpu.vector_store %arg10[%c1_60, %c0_61, %c0_62], %80 {strides = array<i32>} : memref<2x32x128xf32, #tpu.memory_space<vmem>>, vector<1x32x128xf32>,
    return
  }
  func.func @transform_0(%arg0: i32) -> (i32, i32, i32) {
    %c0_i32 = arith.constant 0 : i32
    %c0_i32_0 = arith.constant 0 : i32
    %c0_i32_1 = arith.constant 0 : i32
    return %arg0, %c0_i32, %c0_i32_0 : i32, i32, i32
  }
  func.func @transform_1(%arg0: i32) -> (i32, i32) {
    %c0_i32 = arith.constant 0 : i32
    %c0_i32_0 = arith.constant 0 : i32
    %c0_i32_1 = arith.constant 0 : i32
    return %c0_i32, %c0_i32_0 : i32, i32
  }
  func.func @transform_2(%arg0: i32) -> (i32, i32) {
    %c0_i32 = arith.constant 0 : i32
    %c0_i32_0 = arith.constant 0 : i32
    %c0_i32_1 = arith.constant 0 : i32
    return %c0_i32, %c0_i32_0 : i32, i32
  }
  func.func @transform_3(%arg0: i32) -> (i32, i32) {
    %c0_i32 = arith.constant 0 : i32
    %c0_i32_0 = arith.constant 0 : i32
    %c0_i32_1 = arith.constant 0 : i32
    return %c0_i32, %c0_i32_0 : i32, i32
  }
  func.func @transform_4(%arg0: i32) -> (i32, i32) {
    %c0_i32 = arith.constant 0 : i32
    %c0_i32_0 = arith.constant 0 : i32
    %c0_i32_1 = arith.constant 0 : i32
    return %c0_i32, %c0_i32_0 : i32, i32
  }
  func.func @transform_5(%arg0: i32) -> (i32, i32) {
    %c0_i32 = arith.constant 0 : i32
    %c0_i32_0 = arith.constant 0 : i32
    %c0_i32_1 = arith.constant 0 : i32
    return %c0_i32, %c0_i32_0 : i32, i32
  }
  func.func @transform_6(%arg0: i32) -> (i32, i32) {
    %c0_i32 = arith.constant 0 : i32
    %c0_i32_0 = arith.constant 0 : i32
    %c0_i32_1 = arith.constant 0 : i32
    return %c0_i32, %c0_i32_0 : i32, i32
  }
  func.func @transform_7(%arg0: i32) -> (i32, i32) {
    %c0_i32 = arith.constant 0 : i32
    %c0_i32_0 = arith.constant 0 : i32
    %c0_i32_1 = arith.constant 0 : i32
    return %c0_i32, %c0_i32_0 : i32, i32
  }
  func.func @transform_8(%arg0: i32) -> (i32, i32) {
    %c0_i32 = arith.constant 0 : i32
    %c0_i32_0 = arith.constant 0 : i32
    %c0_i32_1 = arith.constant 0 : i32
    return %c0_i32, %c0_i32_0 : i32, i32
  }
  func.func @transform_9(%arg0: i32) -> (i32, i32, i32) {
    %c0_i32 = arith.constant 0 : i32
    %c0_i32_0 = arith.constant 0 : i32
    %c0_i32_1 = arith.constant 0 : i32
    return %arg0, %c0_i32, %c0_i32_0 : i32, i32, i32
  }
}

</mosaic_0001>

<bundles_post_ra>
// kernel: tpu_custom_call.1
= control target key start
LH: loop header
LB: loop body
LE: loop exit
PB: predicated region body
PF: predicated region fallthrough
CT: control target
= control target key end

     0   :  { %14 = vsyncpa [#allocation4], 0  ;;  %s2678_s0 = inlined_call_operand.vmem [shape: f32[4,32,128], index: 0, kind: input, shape index: {}]   ;;  %s2679_s1 = inlined_call_operand.hbm [shape: f32[128,128], index: 1, kind: input, shape index: {}]   ;;  %s2680_s2 = inlined_call_operand.vmem [shape: f32[32,32], index: 2, kind: input, shape index: {}]   ;;  %s2681_s3 = inlined_call_operand.vmem [shape: f32[32,1], index: 3, kind: input, shape index: {}]   ;;  %s2682_s4 = inlined_call_operand.vmem [shape: f32[32,1], index: 4, kind: input, shape index: {}]   ;;  %s2683_s5 = inlined_call_operand.vmem [shape: f32[32,1], index: 5, kind: input, shape index: {}]   ;;  %s2684_s6 = inlined_call_operand.hbm [shape: f32[32,96], index: 6, kind: input, shape index: {}]   ;;  %s2685_s7 = inlined_call_operand.vmem [shape: f32[32,1], index: 7, kind: input, shape index: {}]   ;;  %s2686_s8 = inlined_call_operand.vmem [shape: f32[32,1], index: 8, kind: input, shape index: {}]   ;;  %s2687_s9 = inlined_call_operand.hbm [shape: f32[4,32,128], index: 9, kind: output, shape index: {}]  }
   0x1   :  { %15 = vsyncpa [#allocation7], 0 }
   0x2   :  { %16 = vsyncpa [#allocation5], 0 }
   0x3   :  { %18 = vsyncpa [#allocation5 + $0x1], 0  ;;  %s2183_s30 = smov 0   ;;  %s2185_s10 = smov 0  }
   0x4   :  { %s2187_s11 = smov 0   ;;  %s2189_s12 = smov 0  }
   0x5 LB: > { %2694 = sst [smem:[#allocation12_spill]] %s2115_s11  ;;  %s2204_s13 = sadd.s32 4294967295, %s2119_s12   ;;  %s2119_s12 = sphi %s2189_s12, %s2708_s12   ;;  %s2115_s11 = sphi %s2187_s11, %s2710_s11   ;;  %s2111_s10 = sphi %s2185_s10, %s2712_s10   ;;  %s2107_s30 = sphi %s2183_s30, %s2711_s30  }
   0x6   : > { %s1417_s14 = sadd.s32 4294967294, %s2119_s12   ;;  %s2208_s15 = sadd.s32 1, %s2119_s12  }
   0x7   : > { %2695 = sst [smem:[#allocation13_spill]] %s2208_s15  ;;  %s225_s16 = sadd.s32 1, %s2115_s11 }
   0x8   : > { %s222_s17 = ssub.s32 %s2119_s12, %s2208_s15  ;;  %p235_p0 = scmp.ne.s32.totalorder %s2115_s11, %s2111_s10 }
   0x9   : > { %p223_p1 = scmp.eq.s32.totalorder %s222_s17, 0  ;;  %p236_p2 = scmp.eq.s32.totalorder %s2204_s13, 1 }
   0xa   : > { %p241_p3 = scmp.ne.s32.totalorder %s2111_s10, %s2107_s30  ;;  %p242_p4 = scmp.eq.s32.totalorder %s1417_s14, 1 }
   0xb   : > { %s2219_s18 = scalar_select %p223_p1, %s2115_s11, %s225_s16  }
   0xc   : > { %p2221_p5 = por %p236_p2, %p235_p0  ;;  %p2225_p6 = por %p242_p4, %p241_p3 }
   0xd   : > { %2696 = sst [smem:[#allocation14_spill]] %s2219_s18  ;;  %p1418_p7 = scmp.ge.s32.totalorder %s2119_s12, 1 }
   0xe   : > { %s2697_s19 = scalar_select %p2221_p5, 1, 0 }
   0xf   : > { %s2698_s20 = scalar_select %p2225_p6, 1, 0 }
  0x10   : > { %p249_p8 = scmp.lt.s32.totalorder %s2119_s12, 3  ;;  %p2688_p9 = scmp.eq.s32.totalorder %s2204_s13, 0 }
  0x11   : > { %s2121_s22 = smov [#allocation3]   ;;  %s2122_s25 = smov [#allocation6]  }
  0x12   : > { %p2232_p10 = pnand %p1418_p7, %p249_p8  ;;  %s261_s23 = sshll.u32 %s2121_s22, 4  ;;  %s262_s23 = int_to_ptr.vmem [resolvable:$true] %s261_s23 }
  0x13   : > { %s286_s26 = sshll.u32 %s2122_s25, 4  ;;  %s1993_s29 = scalar_lea.hbm %s2679_s1, 2048  ;;  %s2244_s26 = int_to_ptr.vmem [resolvable:$true] %s286_s26 }
  0x14   : > { %s2699_s21 = scalar_select %p2232_p10, 1, 0 }
  0x15   : > { %p1852_p11 = pneg %p2232_p10  ;;  %p1994_p13 = scmp.ne.s32.totalorder %s2679_s1, %s1993_s29 }
  0x16   : > { %p2000_p3 = scmp.lt.u32.totalorder %s1993_s29, %s2679_s1 }
  0x17   : > { %p2240_p12 = pnand %p2688_p9, %p1852_p11 }
  0x19   : > { %p1995_p0 = pneg %p2240_p12 }
  0x1b   : > { %p1996_p1 = pnand %p1995_p0, %p1994_p13 }
  0x1d   : > { %p1997_p2 = pneg %p1996_p1 }
  0x1f   : > { %p2002_p4 = pnand %p2000_p3, %p1997_p2 }
  0x21   : > { %2005 = shalt.err (!%p2002_p4)
}
  0x22   : > { %s2006_s25 = scalar_lea.vmem %s262_s23, 2048  ;;  %p2014_p9 = scmp.lt.s32.totalorder %s262_s23, %s262_s23 }
  0x23   : > { %p2007_p7 = scmp.ne.s32.totalorder %s262_s23, %s2006_s25  ;;  %p2015_p6 = scmp.lt.s32.totalorder %s2006_s25, %s2006_s25 }
  0x25   : > { %p2009_p8 = pnand %p2007_p7, %p1995_p0  ;;  %p2016_p5 = por %p2015_p6, %p2014_p9 }
  0x27   : > { %p2010_p11 = pneg %p2009_p8 }
  0x29   : > { %p2017_p10 = pnand %p2016_p5, %p2010_p11 }
  0x2b   : > { %2020 = shalt.err (!%p2017_p10)
}
  0x2c   : > { %s2123_s27 = smov 128   ;;  %s2124_s28 = smov 8  }
  0x2d   : > { %1855 = dma.hbm_to_vmem [thread:$0]  (!%p2240_p12), %s2679_s1, 2048, %s262_s23, [#allocation4], %s2123_s27, %s2123_s27, %s2124_s28  }
  0x2e   : > { %s2021_s22 = scalar_lea.hbm %s2684_s6, 512 }
  0x2f   : > { %p2022_p13 = scmp.ne.s32.totalorder %s2684_s6, %s2021_s22  ;;  %p2028_p9 = scmp.lt.u32.totalorder %s2021_s22, %s2684_s6 }
  0x31   : > { %p2024_p5 = pnand %p2022_p13, %p1995_p0 }
  0x33   : > { %p2025_p6 = pneg %p2024_p5 }
  0x35   : > { %p2030_p10 = pnand %p2028_p9, %p2025_p6 }
  0x37   : > { %2033 = shalt.err (!%p2030_p10)
}
  0x38   : > { %s2034_s23 = scalar_lea.vmem %s2244_s26, 512  ;;  %p2042_p4 = scmp.lt.s32.totalorder %s2244_s26, %s2244_s26 }
  0x39   : > { %p2035_p1 = scmp.ne.s32.totalorder %s2244_s26, %s2034_s23  ;;  %p2043_p7 = scmp.lt.s32.totalorder %s2034_s23, %s2034_s23 }
  0x3b   : > { %p2037_p2 = pnand %p2035_p1, %p1995_p0  ;;  %p2044_p8 = por %p2043_p7, %p2042_p4 }
  0x3d   : > { %p2038_p3 = pneg %p2037_p2 }
  0x3f   : > { %p2045_p11 = pnand %p2044_p8, %p2038_p3 }
  0x41   : > { %2048 = shalt.err (!%p2045_p11)
}
  0x42   : > { %1858 = dma.hbm_to_vmem [thread:$0]  (!%p2240_p12), %s2684_s6, 512, %s2244_s26, [#allocation7], %s2123_s27, %s2123_s27, %s2124_s28  }
  0x43   : > { %p2701_p13 = scmp.ne.s32.totalorder %s2699_s21, 0 }
  0x44   : > { %p2702_p5 = scmp.eq.s32.totalorder (!%p2701_p13), %s2204_s13, 0 }
  0x45   : > { %318 = sbr.rel (%p2701_p13) target bundleno = 1737 (0x6c9), region = 56 }
  0x4c   : > { %2094 = dma.done.wait (%p2702_p5), [#allocation4], 2048   ;;  %p2703_p0 = pmov %p2702_p5 }
  0x4e   : > { %2096 = vsyncadd (%p2703_p0), [#allocation4], 4294965248  ;;  %p2704_p6 = pmov %p2703_p0 }
  0x4f   : > { %p2705_p9 = pmov %p2703_p0 }
  0x50   : > { %2098 = dma.done.wait (%p2704_p6), [#allocation7], 512  }
  0x51   : > { %2100 = vsyncadd (%p2705_p9), [#allocation7], 4294966784  ;;  %s1426_s18 = sshll.u32 %s2204_s13, 1  ;;  %v2125_v0 = vmov 0   ;;  %vm453_vm0 = vcmask 261120   ;;  %v2326_v6 = vld [vmem:[%s2680_s2] sm:$0xff] }
  0x52   : > { %p360_p10 = scmp.lt.s32.totalorder %s1426_s18, 3  ;;  %1911 = vset.pattern.permute.xlu0 %v2125_v0  ;;  %1912 = vset.pattern.permute.xlu1 %v2125_v0  ;;  %v391_v8 = vld [vmem:[%s2681_s3] sm:$0xff]  ;;  %v393_v9 = vld [vmem:[%s2681_s3 + $0x10] sm:$0xff]  ;;  %v392_v10 = vld [vmem:[%s2681_s3 + $0x8] sm:$0xff]  ;;  %vm411_vm1 = vcmask 130048   ;;  %vm420_vm2 = vcmask 261248  }
  0x53   : > { %1558 = vmatprep.mubr.msk.f32.mxu0 %vm453_vm0, %v2326_v6  ;;  %435 = vperm.xlu0 %1911, %v391_v8   ;;  %v394_v11 = vld [vmem:[%s2681_s3 + $0x18] sm:$0xff]  ;;  %v367_v12 = vld [vmem:[#allocation3] sm:$0xff]  ;;  %v368_v13 = vld [vmem:[#allocation3 + $0x8] sm:$0xff]  ;;  %v2126_v59 = vmov 0.0   ;;  %s2127_s17 = smov 16   ;;  %vm704_vm7 = vcmask 1047680  }
  0x54   : > { %s2714_s18 = smov (!%p360_p10, %s1426_s18), 3  ;;  %445 = vperm.xlu1 %1912, %v393_v9   ;;  %v369_v14 = vld [vmem:[#allocation3 + $0x10] sm:$0xff]  ;;  %v370_v15 = vld [vmem:[#allocation3 + $0x18] sm:$0xff]  ;;  %v2347_v16 = vld [vmem:[%s2680_s2 + $0x8] sm:$0xff]  ;;  %v2352_v18 = vpack.c.bf16 %v368_v13, %v367_v12  ;;  %413 = vst.msk [vmem:[#allocation2 + $0x10] sm:$0xff] %vm411_vm1, %v2126_v59  ;;  %s2128_s22 = smov 112  }
  0x55   : > { %s1459_s21 = sshll.u32 %s2714_s18, 5  ;;  %v395_v17 = vld [vmem:[%s2682_s4] sm:$0xff]  ;;  %v2357_v19 = vld [vmem:[%s2680_s2 + $0x10] sm:$0xff]  ;;  %v396_v20 = vld [vmem:[%s2682_s4 + $0x8] sm:$0xff]  ;;  %v2363_v21 = vpack.c.bf16 %v370_v15, %v369_v14  ;;  %422 = vst.msk [vmem:[#allocation2 + $0x18] sm:$0xff] %vm420_vm2, %v2126_v59  ;;  %vm770_vm8 = vcmask 785408  }
  0x56   : > { %s2307_s27 = scalar_lea.vmem %s2678_s0, %s1459_s21  ;;  %1723 = vmatprep.subr.bf16.mxu1 %v2352_v18  ;;  %v371_v22 = vld [vmem:[#allocation3 + $0x20] sm:$0xff]  ;;  %v372_v23 = vld [vmem:[#allocation3 + $0x28] sm:$0xff]  ;;  %v2372_v24 = vld [vmem:[%s2680_s2 + $0x18] sm:$0xff]  ;;  %412 = vst.msk [vmem:[#allocation2] sm:$0xff] %vm411_vm1, %v2126_v59  ;;  %s2129_s25 = smov 96   ;;  %vm745_vm9 = vcmask 916480  }
  0x57   : > { %v2310_v1 = vld [vmem:[%s2307_s27] sm:$0xff]  ;;  %v2313_v2 = vld [vmem:[%s2307_s27 + $0x8] sm:$0xff]  ;;  %v2316_v3 = vld [vmem:[%s2307_s27 + $0x10] sm:$0xff]  ;;  %440 = vperm.xlu0 %1911, %v392_v10   ;;  %1725 = vmatpush3.bf16.msra.mxu1 %v2352_v18  ;;  %v1730_v27 = vpack.c.bf16 %v372_v23, %v371_v22  ;;  %414 = vst.msk [vmem:[#allocation2 + $0x20] sm:$0xff] %vm411_vm1, %v2126_v59  ;;  %s356_s23 = sand.u32 1, %s2111_s10   ;;  %s1461_s18 = sshll.u32 %s2204_s13, 10 }
  0x58   : > { %v1714_v4 = vpack.c.bf16 %v2313_v2, %v2310_v1  ;;  %v2321_v5 = vld [vmem:[%s2307_s27 + $0x18] sm:$0xff]  ;;  %450 = vperm.xlu1 %1912, %v394_v11   ;;  %v399_v25 = vld [vmem:[%s2683_s5] sm:$0xff]  ;;  %v400_v26 = vld [vmem:[%s2683_s5 + $0x8] sm:$0xff]  ;;  %1727 = vmatprep.subr.bf16.mxu1 %v2363_v21  ;;  %415 = vst.msk [vmem:[#allocation2 + $0x30] sm:$0xff] %vm411_vm1, %v2126_v59  ;;  %s1425_s11 = sshll.u32 %s356_s23, 6  ;;  %s2629_s28 = scalar_lea.hbm %s2687_s9, %s1461_s18 }
  0x59   : > { %v1718_v7 = vpack.c.bf16 %v2321_v5, %v2316_v3  ;;  %v373_v28 = vld [vmem:[#allocation3 + $0x30] sm:$0xff]  ;;  %v374_v29 = vld [vmem:[#allocation3 + $0x38] sm:$0xff]  ;;  %v375_v33 = vld [vmem:[#allocation3 + $0x40] sm:$0xff]  ;;  %416 = vst.msk [vmem:[#allocation2 + $0x40] sm:$0xff] %vm411_vm1, %v2126_v59  ;;  %s2612_s15 = scalar_lea.vmem [#allocation8], %s1425_s11  ;;  %s2637_s13 = scalar_lea.sflag [#allocation5], %s356_s23 }
  0x5a   : > { %1715 = vmatprep.subr.bf16.mxu0 %v1714_v4  ;;  %v397_v30 = vld [vmem:[%s2682_s4 + $0x10] sm:$0xff]  ;;  %v398_v31 = vld [vmem:[%s2682_s4 + $0x18] sm:$0xff]  ;;  %v1734_v32 = vpack.c.bf16 %v374_v29, %v373_v28  ;;  %v376_v34 = vld [vmem:[#allocation3 + $0x48] sm:$0xff]  ;;  %417 = vst.msk [vmem:[#allocation2 + $0x50] sm:$0xff] %vm411_vm1, %v2126_v59  ;;  %s1333_s21 = sshll.u32 %s2612_s15, 4  ;;  %p2706_p1 = scmp.ne.s32.totalorder %s2697_s19, 0  ;;  %s2631_s21 = int_to_ptr.vmem [resolvable:$true] %s1333_s21 }
  0x5b   : > { %1717 = vmatpush3.bf16.msra.mxu0 %v1714_v4  ;;  %553 = vperm.xlu0 %1911, %v395_v17   ;;  %v401_v35 = vld [vmem:[%s2683_s5 + $0x10] sm:$0xff]  ;;  %v402_v36 = vld [vmem:[%s2683_s5 + $0x18] sm:$0xff]  ;;  %v1738_v37 = vpack.c.bf16 %v376_v34, %v375_v33  ;;  %v379_v41 = vld [vmem:[#allocation3 + $0x60] sm:$0xff]  ;;  %418 = vst.msk [vmem:[#allocation2 + $0x60] sm:$0xff] %vm411_vm1, %v2126_v59  ;;  %s2049_s29 = scalar_lea.vmem %s2631_s21, 1024  ;;  %s2130_s14 = smov [#allocation8]  }
  0x5c   : > { %1719 = vmatprep.subr.bf16.mxu0 %v1718_v7  ;;  %558 = vperm.xlu1 %1912, %v396_v20   ;;  %v377_v38 = vld [vmem:[#allocation3 + $0x50] sm:$0xff]  ;;  %v378_v39 = vld [vmem:[#allocation3 + $0x58] sm:$0xff]  ;;  %v380_v42 = vld [vmem:[#allocation3 + $0x68] sm:$0xff]  ;;  %419 = vst.msk [vmem:[#allocation2 + $0x70] sm:$0xff] %vm411_vm1, %v2126_v59  ;;  %p2050_p12 = scmp.ne.s32.totalorder %s2631_s21, %s2049_s29  ;;  %s2053_s16 = sshll.u32 %s2130_s14, 4  ;;  %s2054_s16 = int_to_ptr.vmem [resolvable:$false] %s2053_s16 }
  0x5d   : > { %1729 = vmatpush3.bf16.msra.mxu1 %v2363_v21  ;;  %v1742_v40 = vpack.c.bf16 %v378_v39, %v377_v38  ;;  %v1746_v43 = vpack.c.bf16 %v380_v42, %v379_v41  ;;  %v381_v44 = vld [vmem:[#allocation3 + $0x70] sm:$0xff]  ;;  %v382_v45 = vld [vmem:[#allocation3 + $0x78] sm:$0xff]  ;;  %421 = vst.msk [vmem:[#allocation2 + $0x8] sm:$0xff] %vm420_vm2, %v2126_v59  ;;  %423 = vst.msk [vmem:[#allocation2 + $0x28] sm:$0xff] %vm420_vm2, %v2126_v59  ;;  %p2056_p4 = scmp.lt.s32.totalorder %s2631_s21, %s2054_s16 }
  0x5e   : > { %1731 = vmatprep.subr.bf16.mxu1 %v1730_v27  ;;  %v1750_v46 = vpack.c.bf16 %v382_v45, %v381_v44  ;;  %424 = vst.msk [vmem:[#allocation2 + $0x38] sm:$0xff] %vm420_vm2, %v2126_v59  ;;  %425 = vst.msk [vmem:[#allocation2 + $0x48] sm:$0xff] %vm420_vm2, %v2126_v59  ;;  %p2051_p2 = pnand %p2050_p12, %p2706_p1 }
  0x5f   : > { %1721 = vmatpush3.bf16.msra.mxu0 %v1718_v7  ;;  %662 = vperm.xlu0 %1911, %v399_v25   ;;  %426 = vst.msk [vmem:[#allocation2 + $0x58] sm:$0xff] %vm420_vm2, %v2126_v59  ;;  %427 = vst.msk [vmem:[#allocation2 + $0x68] sm:$0xff] %vm420_vm2, %v2126_v59 }
  0x60   : > { %667 = vperm.xlu1 %1912, %v400_v26   ;;  %428 = vst.msk [vmem:[#allocation2 + $0x78] sm:$0xff] %vm420_vm2, %v2126_v59  ;;  %p2052_p3 = pneg %p2051_p2 }
  0x61   : > { %1733 = vmatpush3.bf16.msra.mxu1 %v1730_v27 }
  0x62   : > { %1559 = vmatmul.mubr.msk.f32.vlgmr.msra.gmra.mrb[0].mxu0 %vm453_vm0, %v2347_v16  ;;  %1735 = vmatprep.subr.bf16.mxu1 %v1734_v32 }
  0x63   : > { %1561 = vmatprep.mubr.msk.f32.mxu0 %vm453_vm0, %v2357_v19  ;;  %563 = vperm.xlu0 %1911, %v397_v30  }
  0x64   : > { %568 = vperm.xlu1 %1912, %v398_v31  }
  0x65   : > { %1737 = vmatpush3.bf16.msra.mxu1 %v1734_v32 }
  0x66   : > { %1562 = vmatmul.mubr.msk.f32.gmra.mrb[2].mxu0 %vm453_vm0, %v2372_v24  ;;  %1739 = vmatprep.subr.bf16.mxu1 %v1738_v37 }
  0x67   : > { %672 = vperm.xlu0 %1911, %v401_v35  }
  0x68   : > { %677 = vperm.xlu1 %1912, %v402_v36  }
  0x69   : > { %1741 = vmatpush3.bf16.msra.mxu1 %v1738_v37 }
  0x6a   : > { %1743 = vmatprep.subr.bf16.mxu1 %v1742_v40 }
  0x6d   : > { %1745 = vmatpush3.bf16.msra.mxu1 %v1742_v40 }
  0x6e   : > { %1747 = vmatprep.subr.bf16.mxu1 %v1746_v43 }
  0x71   : > { %1749 = vmatpush3.bf16.msra.mxu1 %v1746_v43 }
  0x72   : > { %1751 = vmatprep.subr.bf16.mxu1 %v1750_v46 }
  0x75   : > { %1753 = vmatpush3.bf16.msra.mxu1 %v1750_v46 }
  0x76   : > { %1787 = vmatprep.subr.bf16.mxu1 %v2352_v18 }
  0xd2   : > { %v2398_v47 = vpop.permute.xlu0 %435 }
  0xd3   : > { %v2400_v48 = vpop.permute.xlu1 %445 }
  0xd6   : > { %v2402_v51 = vpop.permute.xlu0 %440 }
  0xd7   : > { %v2406_v56 = vpop.permute.xlu1 %450 }
  0xda   : > { %v2431_v61 = vpop.permute.xlu0 %553 }
  0xdb   : > { %v2429_v60 = vpop.permute.xlu1 %558 }
  0xde   : > { %v2435_v63 = vpop.permute.xlu0 %662 }
  0xdf   : > { %v2433_v62 = vpop.permute.xlu1 %667 }
  0xe2   : > { %v2439_v7 = vpop.permute.xlu0 %563 }
  0xe3   : > { %v2437_v0 = vpop.permute.xlu1 %568 }
  0xe6   : > { %v2450_v22 = vpop.permute.xlu0 %672 }
 0x135   : > { %v1560_v49 = vpop.f32.mrb[0].mxu0 }
 0x136   : > { %v532_v50 = vpop.f32.mrb[1].mxu0  ;;  %v538_v53 = vadd.f32 %v1560_v49, %v2402_v51 }
 0x137   : > { %v533_v52 = vadd.f32 %v532_v50, %v2398_v47 }
 0x139   : > { %v1563_v54 = vpop.f32.mrb[2].mxu0  ;;  %1596 = vmatprep.mubr.f32.mxu1 %v533_v52 }
 0x13a   : > { %v542_v55 = vpop.f32.mrb[3].mxu0  ;;  %1597 = vmatmul.mubr.f32.vlgmr.msra.gmra.mrb[0].mxu1 %v538_v53  ;;  %v548_v58 = vadd.f32 %v1563_v54, %v2406_v56 }
 0x13b   : > { %v543_v57 = vadd.f32 %v542_v55, %v2400_v48  ;;  %1789 = vmatpush3.bf16.msra.mxu1 %v2352_v18  ;;  %v2446_v18 = vpop.permute.xlu1 %677 }
 0x13c   : > { %1791 = vmatprep.subr.bf16.mxu1 %v2363_v21 }
 0x13d   : > { %1599 = vmatprep.mubr.f32.mxu1 %v543_v57 }
 0x13e   : > { %1600 = vmatmul.mubr.f32.gmra.mrb[2].mxu1 %v548_v58 }
 0x13f   : > { %1793 = vmatpush3.bf16.msra.mxu1 %v2363_v21 }
 0x140   : > { %1795 = vmatprep.subr.bf16.mxu1 %v1730_v27 }
 0x143   : > { %1797 = vmatpush3.bf16.msra.mxu1 %v1730_v27 }
 0x144   : > { %1799 = vmatprep.subr.bf16.mxu1 %v1734_v32 }
 0x147   : > { %1801 = vmatpush3.bf16.msra.mxu1 %v1734_v32 }
 0x148   : > { %1803 = vmatprep.subr.bf16.mxu1 %v1738_v37 }
 0x14b   : > { %1805 = vmatpush3.bf16.msra.mxu1 %v1738_v37 }
 0x14c   : > { %1807 = vmatprep.subr.bf16.mxu1 %v1742_v40 }
 0x14f   : > { %1809 = vmatpush3.bf16.msra.mxu1 %v1742_v40 }
 0x150   : > { %1811 = vmatprep.subr.bf16.mxu1 %v1746_v43 }
 0x153   : > { %1813 = vmatpush3.bf16.msra.mxu1 %v1746_v43 }
 0x154   : > { %1815 = vmatprep.subr.bf16.mxu1 %v1750_v46 }
 0x157   : > { %1817 = vmatpush3.bf16.msra.mxu1 %v1750_v46  ;;  %v2469_v46 = vld [vmem:[#allocation6] sm:$0xff] }
 0x158   : > { %1626 = vmatprep.mubr.msk.f32.mxu0 %vm770_vm8, %v2469_v46 }
 0x20d   : > { %v1598_v4 = vpop.f32.mrb[0].mxu1 }
 0x20e   : > { %v643_v8 = vadd.f32 %v1598_v4, %v2429_v60  ;;  %v637_v9 = vpop.f32.mrb[1].mxu1 }
 0x20f   : > { %v638_v10 = vadd.f32 %v637_v9, %v2431_v61 }
 0x210   : > { %v681_v11 = vmul.f32 %v2433_v62, %v643_v8  ;;  %vm657_vm3 = vcmp.ge.f32.partialorder %v643_v8, 0.0 }
 0x211   : > { %v680_v12 = vmul.f32 %v2435_v63, %v638_v10  ;;  %v1601_v13 = vpop.f32.mrb[2].mxu1  ;;  %vm656_vm4 = vcmp.ge.f32.partialorder %v638_v10, 0.0 }
 0x212   : > { %v653_v14 = vadd.f32 %v1601_v13, %v2437_v0  ;;  %v647_v15 = vpop.f32.mrb[3].mxu1  ;;  %v685_v17 = vsel %vm657_vm3, %v643_v8, %v681_v11 }
 0x213   : > { %v648_v20 = vadd.f32 %v647_v15, %v2439_v7  ;;  %694 = vrot.lane.b32.xlu1 %v685_v17, %s2127_s17  ;;  %v684_v21 = vsel %vm656_vm4, %v638_v10, %v680_v12 }
 0x214   : > { %v683_v23 = vmul.f32 %v2446_v18, %v653_v14  ;;  %692 = vrot.lane.b32.xlu0 %v684_v21, %s2127_s17  ;;  %vm659_vm5 = vcmp.ge.f32.partialorder %v653_v14, 0.0 }
 0x215   : > { %v682_v25 = vmul.f32 %v2450_v22, %v648_v20  ;;  %vm658_vm6 = vcmp.ge.f32.partialorder %v648_v20, 0.0 }
 0x216   : > { %v687_v26 = vsel %vm659_vm5, %v653_v14, %v683_v23 }
 0x217   : > { %698 = vrot.lane.b32.xlu1 %v687_v26, %s2127_s17  ;;  %v686_v27 = vsel %vm658_vm6, %v648_v20, %v682_v25 }
 0x218   : > { %696 = vrot.lane.b32.xlu0 %v686_v27, %s2127_s17 }
 0x285   : > { %v695_v28 = vpop.permute.xlu1 %694 }
 0x286   : > { %707 = vst.msk [vmem:[#allocation2 + $0x10] sm:$0xff] %vm704_vm7, %v695_v28  ;;  %v693_v29 = vpop.permute.xlu0 %692 }
 0x287   : > { %708 = vst.msk [vmem:[#allocation2 + $0x18] sm:$0xff] %vm411_vm1, %v695_v28  ;;  %706 = vst.msk [vmem:[#allocation2 + $0x8] sm:$0xff] %vm411_vm1, %v693_v29 }
 0x288   : > { %705 = vst.msk [vmem:[#allocation2] sm:$0xff] %vm704_vm7, %v693_v29 }
 0x289   : > { %v699_v30 = vpop.permute.xlu1 %698 }
 0x28a   : > { %711 = vst.msk [vmem:[#allocation2 + $0x30] sm:$0xff] %vm704_vm7, %v699_v30  ;;  %v697_v31 = vpop.permute.xlu0 %696 }
 0x28b   : > { %712 = vst.msk [vmem:[#allocation2 + $0x38] sm:$0xff] %vm411_vm1, %v699_v30  ;;  %710 = vst.msk [vmem:[#allocation2 + $0x28] sm:$0xff] %vm411_vm1, %v697_v31 }
 0x28c   : > { %709 = vst.msk [vmem:[#allocation2 + $0x20] sm:$0xff] %vm704_vm7, %v697_v31 }
 0x28d   : > { %v714_v32 = vld [vmem:[#allocation2 + $0x10] sm:$0xff] }
 0x28e   : > { %v718_v33 = vld [vmem:[#allocation2 + $0x18] sm:$0xff]  ;;  %v717_v36 = vld [vmem:[#allocation2 + $0x8] sm:$0xff] }
 0x28f   : > { %v1913_v34 = vpack.i.bf16 %v718_v33, %v714_v32  ;;  %v713_v35 = vld [vmem:[#allocation2] sm:$0xff] }
 0x290   : > { %v1918_v37 = vpack.i.bf16 %v717_v36, %v713_v35  ;;  %v1754_v38 = vpack.c.bf16 %v714_v32, %v713_v35  ;;  %v2484_v36 = vld [vmem:[%s2307_s27 + $0x20] sm:$0xff] }
 0x291   : > { %1914 = vrot.lane.b32.xlu1 %v1913_v34, %s2128_s22  ;;  %v716_v39 = vld [vmem:[#allocation2 + $0x30] sm:$0xff] }
 0x292   : > { %1919 = vrot.lane.b32.xlu0 %v1918_v37, %s2128_s22  ;;  %1755 = vmatprep.subr.bf16.mxu0 %v1754_v38  ;;  %v720_v40 = vld [vmem:[#allocation2 + $0x38] sm:$0xff]  ;;  %v719_v43 = vld [vmem:[#allocation2 + $0x28] sm:$0xff] }
 0x293   : > { %1757 = vmatpush3.bf16.msra.mxu0 %v1754_v38  ;;  %v1923_v41 = vpack.i.bf16 %v720_v40, %v716_v39  ;;  %v715_v42 = vld [vmem:[#allocation2 + $0x20] sm:$0xff] }
 0x294   : > { %v1928_v44 = vpack.i.bf16 %v719_v43, %v715_v42  ;;  %v1758_v45 = vpack.c.bf16 %v716_v39, %v715_v42  ;;  %v2494_v42 = vld [vmem:[%s2307_s27 + $0x30] sm:$0xff]  ;;  %v2497_v43 = vld [vmem:[%s2307_s27 + $0x38] sm:$0xff] }
 0x295   : > { %1924 = vrot.lane.b32.xlu1 %v1923_v41, %s2128_s22 }
 0x296   : > { %1929 = vrot.lane.b32.xlu0 %v1928_v44, %s2128_s22  ;;  %1759 = vmatprep.subr.bf16.mxu0 %v1758_v45 }
 0x297   : > { %1761 = vmatpush3.bf16.msra.mxu0 %v1758_v45  ;;  %v2501_v45 = vld [vmem:[#allocation6 + $0x10] sm:$0xff] }
 0x299   : > { %1939 = vrot.lane.b32.xlu1 %v1913_v34, %s2129_s25 }
 0x29a   : > { %1934 = vrot.lane.b32.xlu0 %v1918_v37, %s2129_s25  ;;  %v2487_v37 = vld [vmem:[%s2307_s27 + $0x28] sm:$0xff] }
 0x29d   : > { %1949 = vrot.lane.b32.xlu1 %v1923_v41, %s2129_s25  ;;  %v1778_v41 = vpack.c.bf16 %v2487_v37, %v2484_v36 }
 0x29e   : > { %1944 = vrot.lane.b32.xlu0 %v1928_v44, %s2129_s25  ;;  %v2499_v44 = vld [vmem:[#allocation6 + $0x8] sm:$0xff] }
 0x303   : > { %v1915_v49 = vpop.permute.xlu1 %1914 }
 0x304   : > { %v1917_v50 = vunpack.i.h.bf16 %v1915_v49  ;;  %v1916_v52 = vunpack.i.l.bf16 %v1915_v49  ;;  %v1920_v53 = vpop.permute.xlu0 %1919  ;;  %v1782_v49 = vpack.c.bf16 %v2497_v43, %v2494_v42 }
 0x305   : > { %v1922_v54 = vunpack.i.h.bf16 %v1920_v53  ;;  %v1921_v55 = vunpack.i.l.bf16 %v1920_v53 }
 0x306   : > { %v747_v57 = vsel %vm745_vm9, %v1916_v52, %v1917_v50  ;;  %v2509_v50 = vld [vmem:[#allocation6 + $0x18] sm:$0xff] }
 0x307   : > { %v1925_v58 = vpop.permute.xlu1 %1924  ;;  %v746_v59 = vsel %vm745_vm9, %v1921_v55, %v1922_v54 }
 0x308   : > { %v1927_v4 = vunpack.i.h.bf16 %v1925_v58  ;;  %v1926_v8 = vunpack.i.l.bf16 %v1925_v58  ;;  %v1930_v9 = vpop.permute.xlu0 %1929  ;;  %v1762_v10 = vpack.c.bf16 %v747_v57, %v746_v59 }
 0x309   : > { %v1932_v11 = vunpack.i.h.bf16 %v1930_v9  ;;  %v1931_v12 = vunpack.i.l.bf16 %v1930_v9 }
 0x30a   : > { %1763 = vmatprep.subr.bf16.mxu0 %v1762_v10  ;;  %v749_v13 = vsel %vm745_vm9, %v1926_v8, %v1927_v4 }
 0x30b   : > { %v1940_v14 = vpop.permute.xlu1 %1939  ;;  %1765 = vmatpush3.bf16.msra.mxu0 %v1762_v10  ;;  %v748_v15 = vsel %vm745_vm9, %v1931_v12, %v1932_v11 }
 0x30c   : > { %v1942_v17 = vunpack.i.h.bf16 %v1940_v14  ;;  %v1941_v20 = vunpack.i.l.bf16 %v1940_v14  ;;  %v1935_v21 = vpop.permute.xlu0 %1934  ;;  %v1766_v23 = vpack.c.bf16 %v749_v13, %v748_v15 }
 0x30d   : > { %v1937_v25 = vunpack.i.h.bf16 %v1935_v21  ;;  %v1936_v26 = vunpack.i.l.bf16 %v1935_v21 }
 0x30e   : > { %1767 = vmatprep.subr.bf16.mxu0 %v1766_v23  ;;  %v772_v27 = vsel %vm770_vm8, %v1941_v20, %v1942_v17 }
 0x30f   : > { %v1950_v28 = vpop.permute.xlu1 %1949  ;;  %1769 = vmatpush3.bf16.msra.mxu0 %v1766_v23  ;;  %v771_v29 = vsel %vm770_vm8, %v1936_v26, %v1937_v25 }
 0x310   : > { %v1952_v30 = vunpack.i.h.bf16 %v1950_v28  ;;  %v1951_v31 = vunpack.i.l.bf16 %v1950_v28  ;;  %v1945_v32 = vpop.permute.xlu0 %1944  ;;  %v1770_v33 = vpack.c.bf16 %v772_v27, %v771_v29 }
 0x311   : > { %v1947_v34 = vunpack.i.h.bf16 %v1945_v32  ;;  %v1946_v35 = vunpack.i.l.bf16 %v1945_v32 }
 0x312   : > { %1771 = vmatprep.subr.bf16.mxu0 %v1770_v33  ;;  %v774_v38 = vsel %vm770_vm8, %v1951_v31, %v1952_v30 }
 0x313   : > { %1773 = vmatpush3.bf16.msra.mxu0 %v1770_v33  ;;  %v773_v39 = vsel %vm770_vm8, %v1946_v35, %v1947_v34  ;;  %v404_v34 = vld [vmem:[%s2685_s7 + $0x8] sm:$0xff]  ;;  %v403_v35 = vld [vmem:[%s2685_s7] sm:$0xff] }
 0x314   : > { %v1774_v40 = vpack.c.bf16 %v774_v38, %v773_v39  ;;  %v406_v38 = vld [vmem:[%s2685_s7 + $0x18] sm:$0xff]  ;;  %v405_v39 = vld [vmem:[%s2685_s7 + $0x10] sm:$0xff] }
 0x316   : > { %1775 = vmatprep.subr.bf16.mxu0 %v1774_v40 }
 0x317   : > { %1777 = vmatpush3.bf16.msra.mxu0 %v1774_v40  ;;  %v408_v40 = vld [vmem:[%s2686_s8 + $0x8] sm:$0xff] }
 0x318   : > { %1779 = vmatprep.subr.bf16.mxu0 %v1778_v41 }
 0x31a   : > { %1627 = vmatmul.mubr.msk.f32.vlgmr.msra.gmra.mrb[4].mxu0 %vm770_vm8, %v2499_v44 }
 0x31b   : > { %1781 = vmatpush3.bf16.msra.mxu0 %v1778_v41  ;;  %1629 = vmatprep.mubr.msk.f32.mxu0 %vm770_vm8, %v2501_v45  ;;  %v407_v41 = vld [vmem:[%s2686_s8] sm:$0xff] }
 0x31c   : > { %1783 = vmatprep.subr.bf16.mxu0 %v1782_v49 }
 0x31e   : > { %1630 = vmatmul.mubr.msk.f32.gmra.mrb[6].mxu0 %vm770_vm8, %v2509_v50 }
 0x31f   : > { %1785 = vmatpush3.bf16.msra.mxu0 %v1782_v49  ;;  %1640 = vmatprep.mubr.msk.f32.mxu0 %vm453_vm0, %v2326_v6  ;;  %v410_v49 = vld [vmem:[%s2686_s8 + $0x18] sm:$0xff] }
 0x322   : > { %1641 = vmatmul.mubr.msk.f32.vlgmr.msra.gmra.mrb[8].mxu0 %vm453_vm0, %v2347_v16 }
 0x323   : > { %1643 = vmatprep.mubr.msk.f32.mxu0 %vm453_vm0, %v2357_v19 }
 0x326   : > { %1644 = vmatmul.mubr.msk.f32.gmra.mrb[10].mxu0 %vm453_vm0, %v2372_v24 }
 0x327   : > { %1708 = vmatprep.mubr.msk.f32.mxu0 %vm770_vm8, %v2469_v46 }
 0x3ed   : > { %v2523_v52 = vpop.f32.mrb[4].mxu0 }
 0x3ee   : > { %v2525_v53 = vpop.f32.mrb[5].mxu0 }
 0x3f1   : > { %v2527_v54 = vpop.f32.mrb[6].mxu0 }
 0x3f2   : > { %v2529_v55 = vpop.f32.mrb[7].mxu0 }
 0x3f5   : > { %v1642_v6 = vpop.f32.mrb[8].mxu0 }
 0x3f6   : > { %v1007_v57 = vpop.f32.mrb[9].mxu0  ;;  %v1013_v19 = vadd.f32 %v1642_v6, %v2402_v51  ;;  %v409_v6 = vld [vmem:[%s2686_s8 + $0x10] sm:$0xff] }
 0x3f7   : > { %v1008_v16 = vadd.f32 %v1007_v57, %v2398_v47 }
 0x3f9   : > { %v1645_v58 = vpop.f32.mrb[10].mxu0  ;;  %1678 = vmatprep.mubr.f32.mxu1 %v1008_v16 }
 0x3fa   : > { %v1017_v24 = vpop.f32.mrb[11].mxu0  ;;  %1679 = vmatmul.mubr.f32.vlgmr.msra.gmra.mrb[4].mxu1 %v1013_v19  ;;  %v1023_v59 = vadd.f32 %v1645_v58, %v2406_v56 }
 0x3fb   : > { %v1018_v46 = vadd.f32 %v1017_v24, %v2400_v48 }
 0x3fd   : > { %1681 = vmatprep.mubr.f32.mxu1 %v1018_v46 }
 0x3fe   : > { %1682 = vmatmul.mubr.f32.gmra.mrb[6].mxu1 %v1023_v59 }
 0x4cd   : > { %v1680_v4 = vpop.f32.mrb[4].mxu1 }
 0x4ce   : > { %v1098_v8 = vadd.f32 %v1680_v4, %v2429_v60  ;;  %v1092_v9 = vpop.f32.mrb[5].mxu1 }
 0x4cf   : > { %v1093_v10 = vadd.f32 %v1092_v9, %v2431_v61 }
 0x4d0   : > { %v1116_v47 = vmul.f32 %v1098_v8, %v2433_v62  ;;  %vm1112_vm10 = vcmp.ge.f32.partialorder %v1098_v8, 0.0 }
 0x4d1   : > { %v1115_v51 = vmul.f32 %v1093_v10, %v2435_v63  ;;  %v1683_v11 = vpop.f32.mrb[6].mxu1  ;;  %vm1111_vm11 = vcmp.ge.f32.partialorder %v1093_v10, 0.0 }
 0x4d2   : > { %v1108_v12 = vadd.f32 %v1683_v11, %v2437_v0  ;;  %v1102_v48 = vpop.f32.mrb[7].mxu1  ;;  %v1120_v13 = vsel %vm1112_vm10, %v1098_v8, %v1116_v47 }
 0x4d3   : > { %v1103_v56 = vadd.f32 %v1102_v48, %v2439_v7  ;;  %1129 = vrot.lane.b32.xlu1 %v1120_v13, %s2127_s17  ;;  %v1119_v14 = vsel %vm1111_vm11, %v1093_v10, %v1115_v51 }
 0x4d4   : > { %v1118_v60 = vmul.f32 %v1108_v12, %v2446_v18  ;;  %1127 = vrot.lane.b32.xlu0 %v1119_v14, %s2127_s17  ;;  %vm1114_vm12 = vcmp.ge.f32.partialorder %v1108_v12, 0.0 }
 0x4d5   : > { %v1117_v61 = vmul.f32 %v1103_v56, %v2450_v22  ;;  %vm1113_vm13 = vcmp.ge.f32.partialorder %v1103_v56, 0.0 }
 0x4d6   : > { %v1122_v62 = vsel %vm1114_vm12, %v1108_v12, %v1118_v60 }
 0x4d7   : > { %1133 = vrot.lane.b32.xlu1 %v1122_v62, %s2127_s17  ;;  %v1121_v63 = vsel %vm1113_vm13, %v1103_v56, %v1117_v61 }
 0x4d8   : > { %1131 = vrot.lane.b32.xlu0 %v1121_v63, %s2127_s17  ;;  %s2055_s17 = scalar_lea.vmem %s2054_s16, 2048 }
 0x4d9   : > { %p2057_p7 = scmp.lt.s32.totalorder %s2055_s17, %s2049_s29 }
 0x4db   : > { %p2058_p8 = por %p2057_p7, %p2056_p4 }
 0x4dd   : > { %p2059_p11 = pnand %p2058_p8, %p2052_p3 }
 0x545   : > { %v1130_v0 = vpop.permute.xlu1 %1129 }
 0x546   : > { %1142 = vst.msk [vmem:[#allocation2 + $0x50] sm:$0xff] %vm704_vm7, %v1130_v0  ;;  %v1128_v7 = vpop.permute.xlu0 %1127 }
 0x547   : > { %1143 = vst.msk [vmem:[#allocation2 + $0x58] sm:$0xff] %vm411_vm1, %v1130_v0  ;;  %1141 = vst.msk [vmem:[#allocation2 + $0x48] sm:$0xff] %vm411_vm1, %v1128_v7 }
 0x548   : > { %1140 = vst.msk [vmem:[#allocation2 + $0x40] sm:$0xff] %vm704_vm7, %v1128_v7 }
 0x549   : > { %v1134_v18 = vpop.permute.xlu1 %1133 }
 0x54a   : > { %1146 = vst.msk [vmem:[#allocation2 + $0x70] sm:$0xff] %vm704_vm7, %v1134_v18  ;;  %v1132_v22 = vpop.permute.xlu0 %1131 }
 0x54b   : > { %1147 = vst.msk [vmem:[#allocation2 + $0x78] sm:$0xff] %vm411_vm1, %v1134_v18  ;;  %1145 = vst.msk [vmem:[#allocation2 + $0x68] sm:$0xff] %vm411_vm1, %v1132_v22 }
 0x54c   : > { %1144 = vst.msk [vmem:[#allocation2 + $0x60] sm:$0xff] %vm704_vm7, %v1132_v22 }
 0x54d   : > { %v1149_v15 = vld [vmem:[#allocation2 + $0x50] sm:$0xff] }
 0x54e   : > { %v1153_v17 = vld [vmem:[#allocation2 + $0x58] sm:$0xff]  ;;  %v1152_v23 = vld [vmem:[#allocation2 + $0x48] sm:$0xff] }
 0x54f   : > { %v1953_v20 = vpack.i.bf16 %v1153_v17, %v1149_v15  ;;  %v1148_v21 = vld [vmem:[#allocation2 + $0x40] sm:$0xff] }
 0x550   : > { %v1958_v25 = vpack.i.bf16 %v1152_v23, %v1148_v21  ;;  %v1818_v26 = vpack.c.bf16 %v1149_v15, %v1148_v21 }
 0x551   : > { %1954 = vrot.lane.b32.xlu1 %v1953_v20, %s2128_s22  ;;  %v1151_v27 = vld [vmem:[#allocation2 + $0x70] sm:$0xff] }
 0x552   : > { %1959 = vrot.lane.b32.xlu0 %v1958_v25, %s2128_s22  ;;  %1819 = vmatprep.subr.bf16.mxu0 %v1818_v26  ;;  %v1155_v28 = vld [vmem:[#allocation2 + $0x78] sm:$0xff]  ;;  %v1154_v31 = vld [vmem:[#allocation2 + $0x68] sm:$0xff] }
 0x553   : > { %1821 = vmatpush3.bf16.msra.mxu0 %v1818_v26  ;;  %v1963_v29 = vpack.i.bf16 %v1155_v28, %v1151_v27  ;;  %v1150_v30 = vld [vmem:[#allocation2 + $0x60] sm:$0xff] }
 0x554   : > { %v1968_v32 = vpack.i.bf16 %v1154_v31, %v1150_v30  ;;  %v1822_v33 = vpack.c.bf16 %v1151_v27, %v1150_v30 }
 0x555   : > { %1964 = vrot.lane.b32.xlu1 %v1963_v29, %s2128_s22 }
 0x556   : > { %1969 = vrot.lane.b32.xlu0 %v1968_v32, %s2128_s22  ;;  %1823 = vmatprep.subr.bf16.mxu0 %v1822_v33 }
 0x557   : > { %1825 = vmatpush3.bf16.msra.mxu0 %v1822_v33 }
 0x559   : > { %1979 = vrot.lane.b32.xlu1 %v1953_v20, %s2129_s25 }
 0x55a   : > { %1974 = vrot.lane.b32.xlu0 %v1958_v25, %s2129_s25 }
 0x55d   : > { %1989 = vrot.lane.b32.xlu1 %v1963_v29, %s2129_s25 }
 0x55e   : > { %1984 = vrot.lane.b32.xlu0 %v1968_v32, %s2129_s25 }
 0x561   : > { %786 = vperm.xlu1 %1912, %v404_v34  }
 0x562   : > { %781 = vperm.xlu0 %1911, %v403_v35  }
 0x565   : > { %796 = vperm.xlu1 %1912, %v406_v38  }
 0x566   : > { %791 = vperm.xlu0 %1911, %v405_v39  }
 0x569   : > { %911 = vperm.xlu1 %1912, %v408_v40  }
 0x56a   : > { %906 = vperm.xlu0 %1911, %v407_v41  }
 0x56d   : > { %921 = vperm.xlu1 %1912, %v410_v49  }
 0x56e   : > { %916 = vperm.xlu0 %1911, %v409_v6  }
 0x5c3   : > { %v1955_v57 = vpop.permute.xlu1 %1954 }
 0x5c4   : > { %v1957_v16 = vunpack.i.h.bf16 %v1955_v57  ;;  %v1956_v19 = vunpack.i.l.bf16 %v1955_v57  ;;  %v1960_v58 = vpop.permute.xlu0 %1959 }
 0x5c5   : > { %v1962_v24 = vunpack.i.h.bf16 %v1960_v58  ;;  %v1961_v46 = vunpack.i.l.bf16 %v1960_v58 }
 0x5c6   : > { %v1181_v59 = vsel %vm745_vm9, %v1956_v19, %v1957_v16 }
 0x5c7   : > { %v1965_v4 = vpop.permute.xlu1 %1964  ;;  %v1180_v8 = vsel %vm745_vm9, %v1961_v46, %v1962_v24 }
 0x5c8   : > { %v1967_v9 = vunpack.i.h.bf16 %v1965_v4  ;;  %v1966_v10 = vunpack.i.l.bf16 %v1965_v4  ;;  %v1970_v47 = vpop.permute.xlu0 %1969  ;;  %v1826_v51 = vpack.c.bf16 %v1181_v59, %v1180_v8 }
 0x5c9   : > { %v1972_v11 = vunpack.i.h.bf16 %v1970_v47  ;;  %v1971_v12 = vunpack.i.l.bf16 %v1970_v47 }
 0x5ca   : > { %1827 = vmatprep.subr.bf16.mxu0 %v1826_v51  ;;  %v1183_v48 = vsel %vm745_vm9, %v1966_v10, %v1967_v9 }
 0x5cb   : > { %v1980_v13 = vpop.permute.xlu1 %1979  ;;  %1829 = vmatpush3.bf16.msra.mxu0 %v1826_v51  ;;  %v1182_v56 = vsel %vm745_vm9, %v1971_v12, %v1972_v11 }
 0x5cc   : > { %v1982_v14 = vunpack.i.h.bf16 %v1980_v13  ;;  %v1981_v60 = vunpack.i.l.bf16 %v1980_v13  ;;  %v1975_v61 = vpop.permute.xlu0 %1974  ;;  %v1830_v62 = vpack.c.bf16 %v1183_v48, %v1182_v56 }
 0x5cd   : > { %v1977_v63 = vunpack.i.h.bf16 %v1975_v61  ;;  %v1976_v0 = vunpack.i.l.bf16 %v1975_v61 }
 0x5ce   : > { %1831 = vmatprep.subr.bf16.mxu0 %v1830_v62  ;;  %v1205_v7 = vsel %vm770_vm8, %v1981_v60, %v1982_v14 }
 0x5cf   : > { %v1990_v18 = vpop.permute.xlu1 %1989  ;;  %1833 = vmatpush3.bf16.msra.mxu0 %v1830_v62  ;;  %v1204_v22 = vsel %vm770_vm8, %v1976_v0, %v1977_v63 }
 0x5d0   : > { %v1992_v15 = vunpack.i.h.bf16 %v1990_v18  ;;  %v1991_v17 = vunpack.i.l.bf16 %v1990_v18  ;;  %v1985_v20 = vpop.permute.xlu0 %1984  ;;  %v1834_v21 = vpack.c.bf16 %v1205_v7, %v1204_v22 }
 0x5d1   : > { %v1987_v23 = vunpack.i.h.bf16 %v1985_v20  ;;  %v1986_v25 = vunpack.i.l.bf16 %v1985_v20 }
 0x5d2   : > { %1835 = vmatprep.subr.bf16.mxu0 %v1834_v21  ;;  %v1207_v26 = vsel %vm770_vm8, %v1991_v17, %v1992_v15 }
 0x5d3   : > { %1837 = vmatpush3.bf16.msra.mxu0 %v1834_v21  ;;  %v1206_v27 = vsel %vm770_vm8, %v1986_v25, %v1987_v23 }
 0x5d4   : > { %v1838_v28 = vpack.c.bf16 %v1207_v26, %v1206_v27 }
 0x5d6   : > { %1839 = vmatprep.subr.bf16.mxu0 %v1838_v28 }
 0x5d7   : > { %1841 = vmatpush3.bf16.msra.mxu0 %v1838_v28 }
 0x5da   : > { %1709 = vmatmul.mubr.msk.f32.vlgmr.msra.gmra.mrb[12].mxu0 %vm770_vm8, %v2499_v44 }
 0x5db   : > { %1711 = vmatprep.mubr.msk.f32.mxu0 %vm770_vm8, %v2501_v45 }
 0x5de   : > { %1712 = vmatmul.mubr.msk.f32.gmra.mrb[14].mxu0 %vm770_vm8, %v2509_v50 }
 0x5e0   : > { %v787_v29 = vpop.permute.xlu1 %786 }
 0x5e1   : > { %v782_v30 = vpop.permute.xlu0 %781  ;;  %v883_v31 = vadd.f32 %v2523_v52, %v787_v29 }
 0x5e2   : > { %v878_v32 = vadd.f32 %v2525_v53, %v782_v30 }
 0x5e3   : > { %v897_v35 = vadd.f32 %v883_v31, %v2313_v2 }
 0x5e4   : > { %v797_v33 = vpop.permute.xlu1 %796  ;;  %v896_v44 = vadd.f32 %v878_v32, %v2310_v1 }
 0x5e5   : > { %v792_v34 = vpop.permute.xlu0 %791  ;;  %v893_v38 = vadd.f32 %v2527_v54, %v797_v33  ;;  %vm901_vm14 = vcmp.ge.f32.partialorder %v897_v35, 0.0 }
 0x5e6   : > { %v888_v45 = vadd.f32 %v2529_v55, %v792_v34  ;;  %vm900_vm15 = vcmp.ge.f32.partialorder %v896_v44, 0.0 }
 0x5e7   : > { %v899_v52 = vadd.f32 %v893_v38, %v2321_v5 }
 0x5e8   : > { %v912_v50 = vpop.permute.xlu1 %911  ;;  %v898_v41 = vadd.f32 %v888_v45, %v2316_v3 }
 0x5e9   : > { %v925_v39 = vmul.f32 %v912_v50, %v897_v35  ;;  %v907_v40 = vpop.permute.xlu0 %906  ;;  %vm903_vm0 = vcmp.ge.f32.partialorder %v899_v52, 0.0 }
 0x5ea   : > { %v924_v53 = vmul.f32 %v907_v40, %v896_v44  ;;  %vm902_vm1 = vcmp.ge.f32.partialorder %v898_v41, 0.0 }
 0x5eb   : > { %v929_v49 = vsel %vm901_vm14, %v897_v35, %v925_v39 }
 0x5ec   : > { %933 = vst [vmem:[%s2612_s15 + $0x8] sm:$0xff] %v929_v49  ;;  %v928_v1 = vsel %vm900_vm15, %v896_v44, %v924_v53  ;;  %v922_v2 = vpop.permute.xlu1 %921 }
 0x5ed   : > { %932 = vst [vmem:[%s2612_s15] sm:$0xff] %v928_v1  ;;  %v927_v54 = vmul.f32 %v922_v2, %v899_v52  ;;  %v917_v55 = vpop.permute.xlu0 %916 }
 0x5ee   : > { %v926_v6 = vmul.f32 %v917_v55, %v898_v41 }
 0x5ef   : > { %v931_v5 = vsel %vm903_vm0, %v899_v52, %v927_v54 }
 0x5f0   : > { %935 = vst [vmem:[%s2612_s15 + $0x18] sm:$0xff] %v931_v5  ;;  %v930_v57 = vsel %vm902_vm1, %v898_v41, %v926_v6 }
 0x5f1   : > { %934 = vst [vmem:[%s2612_s15 + $0x10] sm:$0xff] %v930_v57 }
 0x6ad   : > { %v1710_v3 = vpop.f32.mrb[12].mxu0 }
 0x6ae   : > { %v1284_v16 = vadd.f32 %v1710_v3, %v787_v29  ;;  %v1278_v19 = vpop.f32.mrb[13].mxu0 }
 0x6af   : > { %v1279_v58 = vadd.f32 %v1278_v19, %v782_v30 }
 0x6b0   : > { %v1298_v24 = vadd.f32 %v2487_v37, %v1284_v16 }
 0x6b1   : > { %v1297_v46 = vadd.f32 %v2484_v36, %v1279_v58  ;;  %v1713_v59 = vpop.f32.mrb[14].mxu0 }
 0x6b2   : > { %vm1302_vm2 = vcmp.ge.f32.partialorder %v1298_v24, 0.0  ;;  %v1306_v4 = vmul.f32 %v1298_v24, %v912_v50  ;;  %v1294_v8 = vadd.f32 %v1713_v59, %v797_v33  ;;  %v1288_v9 = vpop.f32.mrb[15].mxu0 }
 0x6b3   : > { %vm1301_vm3 = vcmp.ge.f32.partialorder %v1297_v46, 0.0  ;;  %v1305_v10 = vmul.f32 %v1297_v46, %v907_v40  ;;  %v1289_v47 = vadd.f32 %v1288_v9, %v792_v34 }
 0x6b4   : > { %v1310_v51 = vsel %vm1302_vm2, %v1298_v24, %v1306_v4  ;;  %v1300_v11 = vadd.f32 %v2497_v43, %v1294_v8 }
 0x6b5   : > { %1450 = vst [vmem:[%s2612_s15 + $0x28] sm:$0xff] %v1310_v51  ;;  %v1309_v37 = vsel %vm1301_vm3, %v1297_v46, %v1305_v10  ;;  %v1299_v36 = vadd.f32 %v2494_v42, %v1289_v47 }
 0x6b6   : > { %1449 = vst [vmem:[%s2612_s15 + $0x20] sm:$0xff] %v1309_v37  ;;  %vm1304_vm4 = vcmp.ge.f32.partialorder %v1300_v11, 0.0  ;;  %v1308_v12 = vmul.f32 %v1300_v11, %v922_v2 }
 0x6b7   : > { %vm1303_vm5 = vcmp.ge.f32.partialorder %v1299_v36, 0.0  ;;  %v1307_v48 = vmul.f32 %v1299_v36, %v917_v55 }
 0x6b8   : > { %v1312_v43 = vsel %vm1304_vm4, %v1300_v11, %v1308_v12 }
 0x6b9   : > { %1452 = vst [vmem:[%s2612_s15 + $0x38] sm:$0xff] %v1312_v43  ;;  %v1311_v13 = vsel %vm1303_vm5, %v1299_v36, %v1307_v48 }
 0x6ba   : > { %1451 = vst [vmem:[%s2612_s15 + $0x30] sm:$0xff] %v1311_v13 }
 0x6bb   : > { %2062 = shalt.err (!%p2059_p11)
}
 0x6bc   : > { %s2063_s22 = scalar_lea.hbm %s2629_s28, 1024  ;;  %s2067_s23 = scalar_lea.hbm %s2687_s9, 2048 }
 0x6bd   : > { %p2064_p13 = scmp.ne.s32.totalorder %s2629_s28, %s2063_s22  ;;  %p2068_p6 = scmp.lt.u32.totalorder %s2629_s28, %s2687_s9 }
 0x6be   : > { %p2069_p9 = scmp.lt.u32.totalorder %s2067_s23, %s2063_s22  ;;  %p2071_p12 = scmp.lt.u32.totalorder %s2063_s22, %s2629_s28 }
 0x6bf   : > { %p2065_p5 = pnand %p2064_p13, %p2706_p1 }
 0x6c0   : > { %p2070_p10 = por %p2069_p9, %p2068_p6 }
 0x6c1   : > { %p2066_p0 = pneg %p2065_p5 }
 0x6c2   : > { %p2072_p2 = por %p2071_p12, %p2070_p10 }
 0x6c4   : > { %p2073_p3 = pnand %p2072_p2, %p2066_p0 }
 0x6c6   : > { %2076 = shalt.err (!%p2073_p3)
}
 0x6c7   : > { %s2131_s18 = smov 128   ;;  %s2132_s24 = smov 8  }
 0x6c8   : > { %1850 = dma.vmem_to_hbm [thread:$0]  (%p2706_p1), %s2631_s21, 1024, %s2629_s28, %s2637_s13, %s2131_s18, %s2131_s18, %s2132_s24  }
 0x6c9 PF: > { %p1867_p4 = scmp.ge.s32.totalorder %s2119_s12, 2  ;;  %s1348_s26 = sand.u32 1, %s2107_s30  }
 0x6ca   : > { %p2707_p7 = scmp.ne.s32.totalorder %s2698_s20, 0  ;;  %s1349_s29 = scalar_lea.sflag [#allocation5], %s1348_s26 }
 0x6cc   : > { %p1860_p8 = pnand %p1867_p4, %p2707_p7 }
 0x6ce   : > { %2102 = dma.done.wait (!%p1860_p8), %s1349_s29, 1024  }
 0x6cf   : > { %2104 = vsyncadd (!%p1860_p8), %s1349_s29, 4294966272  ;;  %s2708_s12 = sld [smem:[#allocation13_spill]]  ;;  %s2709_s14 = sld [smem:[#allocation12_spill]] }
 0x6d0   : > { %s2710_s11 = sld [smem:[#allocation14_spill]]  ;;  %s2711_s30 = smov %s2111_s10 }
 0x6d5   : > { %p21_p11 = scmp.ge.s32.totalorder %s2708_s12, 4   ;;  %s2712_s10 = smov %s2709_s14 }
 0x6d7   :  { %23 = sbr.rel (!%p21_p11) target bundleno = 5 (0x5), region = 103 }
 0x6de   :  { %1354 = vsyncpa [#allocation4], 1 }
 0x6df   :  { %1356 = vsyncpa [#allocation4 + $0x1], 1 }
 0x6e0   :  { %1357 = vsyncpa [#allocation7], 1 }
 0x6e1   :  { %1358 = vsyncpa [#allocation5], 1 }
 0x6e2   :  { %1360 = vsyncpa [#allocation5 + $0x1], 1 }

</bundles_post_ra>
